<compile_context>
chip_gen: v7x
topology: tpu7x:2x2x1
jax: 0.10.0
libtpu: 0.0.40
codegen_flags: <defaults>
</compile_context>

<pallas_src>
import functools

import jax
import jax.numpy as jnp
from jax.experimental import pallas as pl
from jax.experimental.pallas import tpu as pltpu

EPS = 1e-5
F_IN = 516           # 4 * 129 flattened input features
HID = 128
N_CLASSES = 2
C_PAD = 128          # lane-dense head / output width


def _round_up(n, m):
    return (n + m - 1) // m * m


# ---------------- fused path (whole batch fits in one tile) -----------------
def _fused_kernel(x_ref, w1_ref, b1_ref, gamma_ref, beta_ref, w2_ref, b2_ref,
                  out_ref, *, batch):
    x = x_ref[...]                                             # (TM, 516) f32
    h = jnp.dot(x, w1_ref[...], preferred_element_type=jnp.float32) + b1_ref[...]
    h = jnp.maximum(h, 0.0)                                    # ReLU

    # BatchNorm1d (training mode) over the true batch rows only.
    row = jax.lax.broadcasted_iota(jnp.int32, h.shape, 0)
    valid = row < batch
    inv_b = 1.0 / batch
    hm = jnp.where(valid, h, 0.0)
    mean = jnp.sum(hm, axis=0, keepdims=True) * inv_b          # (1, 128)
    d = jnp.where(valid, h - mean, 0.0)
    var = jnp.sum(d * d, axis=0, keepdims=True) * inv_b        # biased variance

    scale = gamma_ref[...] * jax.lax.rsqrt(var + EPS)
    shift = beta_ref[...] - mean * scale
    hn = h * scale + shift

    # Lane-dense head: W2 zero-padded to (128, 128); mask padded classes.
    logits = jnp.dot(hn, w2_ref[...], preferred_element_type=jnp.float32) + b2_ref[...]
    col = jax.lax.broadcasted_iota(jnp.int32, logits.shape, 1)
    logits = jnp.where(col < N_CLASSES, logits, -1e30)

    m = jnp.max(logits, axis=1, keepdims=True)
    e = jnp.exp(logits - m)
    denom = jnp.sum(e, axis=1, keepdims=True)
    out_ref[...] = e * pl.reciprocal(denom, approx=False)


# --------------------- pass 1: encoder + BN statistics ----------------------
def _encoder_kernel(x_ref, w1_ref, b1_ref, h_ref, s1_ref, s2_ref, *, tm, batch):
    i = pl.program_id(0)

    x = x_ref[...]                                             # (TM, 516) f32
    h = jnp.dot(x, w1_ref[...], preferred_element_type=jnp.float32) + b1_ref[...]
    h = jnp.maximum(h, 0.0)                                    # ReLU

    # Zero padded batch rows so they don't pollute the BatchNorm stats.
    row = jax.lax.broadcasted_iota(jnp.int32, (tm, HID), 0) + i * tm
    h = jnp.where(row < batch, h, 0.0)

    h_ref[...] = h                                             # latent tile -> HBM

    @pl.when(i == 0)
    def _():
        s1_ref[...] = jnp.zeros_like(s1_ref)
        s2_ref[...] = jnp.zeros_like(s2_ref)

    s1_ref[...] += jnp.sum(h, axis=0, keepdims=True)           # sum
    s2_ref[...] += jnp.sum(h * h, axis=0, keepdims=True)       # sum of squares


# ------------------ pass 2: BatchNorm + head + softmax ----------------------
def _head_kernel(h_ref, s1_ref, s2_ref, gamma_ref, beta_ref, w2_ref, b2_ref,
                 out_ref, *, batch):
    inv_b = 1.0 / batch
    mean = s1_ref[...] * inv_b                                 # (1, 128)
    var = jnp.maximum(s2_ref[...] * inv_b - mean * mean, 0.0)  # biased variance

    scale = gamma_ref[...] * jax.lax.rsqrt(var + EPS)
    shift = beta_ref[...] - mean * scale
    hn = h_ref[...] * scale + shift                            # (TM, 128)

    logits = jnp.dot(hn, w2_ref[...], preferred_element_type=jnp.float32) + b2_ref[...]
    col = jax.lax.broadcasted_iota(jnp.int32, logits.shape, 1)
    logits = jnp.where(col < N_CLASSES, logits, -1e30)         # mask padded classes

    m = jnp.max(logits, axis=1, keepdims=True)
    e = jnp.exp(logits - m)
    denom = jnp.sum(e, axis=1, keepdims=True)
    out_ref[...] = e * pl.reciprocal(denom, approx=False)


# ------------------------------- wrapper ------------------------------------
def drone_direction_finder(x, params, *, tm=512):
    """x: (B, 4, 129) float32 (NCL).  Returns softmax class probs (B, 2)."""
    B = x.shape[0]
    x2d = x.reshape(B, F_IN).astype(jnp.float32)   # same flattening as torch .reshape(-1, 516)

    TM = _round_up(min(tm, _round_up(B, 8)), 8)
    Bp = _round_up(B, TM)
    n_tiles = Bp // TM

    # Only batch-pad (if needed) — features stay at their native 516 width.
    x_pad = jnp.pad(x2d, ((0, Bp - B), (0, 0))) if Bp != B else x2d
    w2_pad = jnp.pad(params["w2"], ((0, 0), (0, C_PAD - N_CLASSES)))
    b2_pad = jnp.pad(params["b2"], ((0, 0), (0, C_PAD - N_CLASSES)))

    tile = lambda i: (i, 0)   # per-grid-step batch tile
    res = lambda i: (0, 0)    # resident (weights / accumulators)

    if n_tiles == 1:
        # ---- fully fused: everything lives in VMEM for the single tile -----
        out_pad = pl.pallas_call(
            functools.partial(_fused_kernel, batch=B),
            grid=(1,),
            in_specs=[
                pl.BlockSpec((TM, F_IN), res),   # x (full batch tile)
                pl.BlockSpec((F_IN, HID), res),  # W1
                pl.BlockSpec((1, HID), res),     # b1
                pl.BlockSpec((1, HID), res),     # gamma
                pl.BlockSpec((1, HID), res),     # beta
                pl.BlockSpec((HID, C_PAD), res), # W2 (padded)
                pl.BlockSpec((1, C_PAD), res),   # b2 (padded)
            ],
            out_specs=pl.BlockSpec((TM, C_PAD), res),
            out_shape=jax.ShapeDtypeStruct((Bp, C_PAD), jnp.float32),
        )(x_pad, params["w1"], params["b1"], params["gamma"], params["beta"],
          w2_pad, b2_pad)
        return out_pad[:B, :N_CLASSES]

    # ---- pass 1: h = relu(x @ W1 + b1), accumulate sum / sumsq -------------
    h, s1, s2 = pl.pallas_call(
        functools.partial(_encoder_kernel, tm=TM, batch=B),
        grid=(n_tiles,),
        in_specs=[
            pl.BlockSpec((TM, F_IN), tile),      # x tile (double-buffered)
            pl.BlockSpec((F_IN, HID), res),      # W1 resident
            pl.BlockSpec((1, HID), res),         # b1 resident
        ],
        out_specs=(
            pl.BlockSpec((TM, HID), tile),       # latent h
            pl.BlockSpec((1, HID), res),         # sum accumulator
            pl.BlockSpec((1, HID), res),         # sumsq accumulator
        ),
        out_shape=(
            jax.ShapeDtypeStruct((Bp, HID), jnp.float32),
            jax.ShapeDtypeStruct((1, HID), jnp.float32),
            jax.ShapeDtypeStruct((1, HID), jnp.float32),
        ),
        compiler_params=pltpu.CompilerParams(
            dimension_semantics=("arbitrary",)),  # resident accumulators
    )(x_pad, params["w1"], params["b1"])

    # ---- pass 2: BatchNorm + Linear(128->2) + Softmax (lane-dense out) -----
    out_pad = pl.pallas_call(
        functools.partial(_head_kernel, batch=B),
        grid=(n_tiles,),
        in_specs=[
            pl.BlockSpec((TM, HID), tile),       # h tile
            pl.BlockSpec((1, HID), res),         # sum
            pl.BlockSpec((1, HID), res),         # sumsq
            pl.BlockSpec((1, HID), res),         # gamma
            pl.BlockSpec((1, HID), res),         # beta
            pl.BlockSpec((HID, C_PAD), res),     # W2 (padded)
            pl.BlockSpec((1, C_PAD), res),       # b2 (padded)
        ],
        out_specs=pl.BlockSpec((TM, C_PAD), tile),
        out_shape=jax.ShapeDtypeStruct((Bp, C_PAD), jnp.float32),
        compiler_params=pltpu.CompilerParams(
            dimension_semantics=("parallel",)),   # independent tiles -> megacore
    )(h, s1, s2, params["gamma"], params["beta"], w2_pad, b2_pad)

    return out_pad[:B, :N_CLASSES]


def init_params(key):
    """Deterministic init mimicking PyTorch defaults (U(-1/sqrt(fan_in), ..))."""
    k1, k2, k3, k4 = jax.random.split(key, 4)
    lim1 = 1.0 / jnp.sqrt(516.0)
    lim2 = 1.0 / jnp.sqrt(128.0)
    return {
        # stored as (in_features, out_features) so the kernel computes x @ W + b
        "w1": jax.random.uniform(k1, (F_IN, HID), jnp.float32, -lim1, lim1),
        "b1": jax.random.uniform(k2, (1, HID), jnp.float32, -lim1, lim1),
        "gamma": jnp.ones((1, HID), jnp.float32),   # BatchNorm1d weight
        "beta": jnp.zeros((1, HID), jnp.float32),   # BatchNorm1d bias
        "w2": jax.random.uniform(k3, (HID, N_CLASSES), jnp.float32, -lim2, lim2),
        "b2": jax.random.uniform(k4, (1, N_CLASSES), jnp.float32, -lim2, lim2),
    }


def _reference(x, params):
    """Pure-JAX reference for the sanity check (PyTorch training-mode BN)."""
    B = x.shape[0]
    h = x.reshape(B, F_IN) @ params["w1"] + params["b1"]
    h = jnp.maximum(h, 0.0)
    mean = jnp.mean(h, axis=0, keepdims=True)
    var = jnp.mean((h - mean) ** 2, axis=0, keepdims=True)
    h = (h - mean) / jnp.sqrt(var + EPS) * params["gamma"] + params["beta"]
    logits = h @ params["w2"] + params["b2"]
    return jax.nn.softmax(logits, axis=1)


if __name__ == "__main__":
    key = jax.random.PRNGKey(0)
    kx, kx2, kp = jax.random.split(key, 3)

    params = init_params(kp)

    # in_channels=4, length=129  ->  4 * 129 = 516 features after reshape
    # Small batch -> fused single-kernel path.
    x_small = jax.random.normal(kx, (2, 4, 129), jnp.float32)
    out = jax.block_until_ready(drone_direction_finder(x_small, params))
    ref = _reference(x_small, params)
    assert out.shape == (2, N_CLASSES)
    assert jnp.allclose(out, ref, atol=1e-5, rtol=1e-5)
    assert jnp.allclose(jnp.sum(out, axis=1), 1.0, atol=1e-5)

    # Larger (still small) batch with a tiny tile -> exercises the two-pass path.
    x_big = jax.random.normal(kx2, (20, 4, 129), jnp.float32)
    out_big = jax.block_until_ready(drone_direction_finder(x_big, params, tm=8))
    ref_big = _reference(x_big, params)
    assert out_big.shape == (20, N_CLASSES)
    assert jnp.allclose(out_big, ref_big, atol=1e-5, rtol=1e-5)

    print("KERNEL_OK")
</pallas_src>

<mosaic_0001>
module attributes {stable_mosaic.version = 11 : i64} {
  func.func @_fused_kernel(%arg0: i32, %arg1: memref<8x516xf32, #tpu.memory_space<vmem>>, %arg2: memref<516x128xf32, #tpu.memory_space<vmem>>, %arg3: memref<1x128xf32, #tpu.memory_space<vmem>>, %arg4: memref<1x128xf32, #tpu.memory_space<vmem>>, %arg5: memref<1x128xf32, #tpu.memory_space<vmem>>, %arg6: memref<128x128xf32, #tpu.memory_space<vmem>>, %arg7: memref<1x128xf32, #tpu.memory_space<vmem>>, %arg8: memref<8x128xf32, #tpu.memory_space<vmem>>) attributes {dimension_semantics = [#tpu.dimension_semantics<arbitrary>], iteration_bounds = array<i64: 1>, scalar_prefetch = 0 : i64, scratch_operands = 0 : i64, tpu.core_type = #tpu.core_type<tc>, window_params = [{pipeline_mode = #tpu.pipeline_mode<synchronous>, transform_indices = @transform_0, window_bounds = array<i64: 8, 516>}, {pipeline_mode = #tpu.pipeline_mode<synchronous>, transform_indices = @transform_1, window_bounds = array<i64: 516, 128>}, {pipeline_mode = #tpu.pipeline_mode<synchronous>, transform_indices = @transform_2, window_bounds = array<i64: 1, 128>}, {pipeline_mode = #tpu.pipeline_mode<synchronous>, transform_indices = @transform_3, window_bounds = array<i64: 1, 128>}, {pipeline_mode = #tpu.pipeline_mode<synchronous>, transform_indices = @transform_4, window_bounds = array<i64: 1, 128>}, {pipeline_mode = #tpu.pipeline_mode<synchronous>, transform_indices = @transform_5, window_bounds = array<i64: 128, 128>}, {pipeline_mode = #tpu.pipeline_mode<synchronous>, transform_indices = @transform_6, window_bounds = array<i64: 1, 128>}, {pipeline_mode = #tpu.pipeline_mode<synchronous>, transform_indices = @transform_7, window_bounds = array<i64: 8, 128>}]} {
    %c0 = arith.constant 0 : index
    %c0_0 = arith.constant 0 : index
    %0 = vector.load %arg1[%c0, %c0_0] : memref<8x516xf32, #tpu.memory_space<vmem>>, vector<8x516xf32>
    %c0_1 = arith.constant 0 : index
    %c0_2 = arith.constant 0 : index
    %1 = vector.load %arg2[%c0_1, %c0_2] : memref<516x128xf32, #tpu.memory_space<vmem>>, vector<516x128xf32>
    %cst = arith.constant dense<0.000000e+00> : vector<8x128xf32>
    %2 = tpu.matmul %0, %1, %cst {dimension_numbers = #tpu.dot_dimension_numbers<[1], [0], [0], [1], [0, 0, 1, 1], [], []>} : vector<8x516xf32>, vector<516x128xf32>, vector<8x128xf32> -> vector<8x128xf32>
    %c0_3 = arith.constant 0 : index
    %c0_4 = arith.constant 0 : index
    %3 = vector.load %arg3[%c0_3, %c0_4] : memref<1x128xf32, #tpu.memory_space<vmem>>, vector<1x128xf32>
    %4 = vector.broadcast %3 : vector<1x128xf32> to vector<8x128xf32>
    %5 = arith.addf %2, %4 : vector<8x128xf32>
    %cst_5 = arith.constant 0.000000e+00 : f32
    %6 = vector.broadcast %cst_5 : f32 to vector<8x128xf32>
    %7 = arith.maximumf %5, %6 : vector<8x128xf32>
    %8 = tpu.iota {dimensions = array<i32: 0>} : vector<8x128xi32>
    %c2_i32 = arith.constant 2 : i32
    %9 = vector.broadcast %c2_i32 : i32 to vector<8x128xi32>
    %10 = arith.cmpi slt, %8, %9 : vector<8x128xi32>
    %cst_6 = arith.constant 0.000000e+00 : f32
    %11 = vector.broadcast %cst_6 : f32 to vector<8x128xf32>
    %12 = arith.select %10, %7, %11 : vector<8x128xi1>, vector<8x128xf32>
    %cst_7 = arith.constant dense<0.000000e+00> : vector<128xf32>
    %13 = vector.multi_reduction <add>, %12, %cst_7 [0] : vector<8x128xf32> to vector<128xf32>
    %14 = vector.shape_cast %13 : vector<128xf32> to vector<1x128xf32>
    %cst_8 = arith.constant 5.000000e-01 : f32
    %15 = vector.broadcast %cst_8 : f32 to vector<1x128xf32>
    %16 = arith.mulf %14, %15 : vector<1x128xf32>
    %17 = vector.broadcast %16 : vector<1x128xf32> to vector<8x128xf32>
    %18 = arith.subf %7, %17 : vector<8x128xf32>
    %cst_9 = arith.constant 0.000000e+00 : f32
    %19 = vector.broadcast %cst_9 : f32 to vector<8x128xf32>
    %20 = arith.select %10, %18, %19 : vector<8x128xi1>, vector<8x128xf32>
    %21 = arith.mulf %20, %20 : vector<8x128xf32>
    %cst_10 = arith.constant dense<0.000000e+00> : vector<128xf32>
    %22 = vector.multi_reduction <add>, %21, %cst_10 [0] : vector<8x128xf32> to vector<128xf32>
    %23 = vector.shape_cast %22 : vector<128xf32> to vector<1x128xf32>
    %cst_11 = arith.constant 5.000000e-01 : f32
    %24 = vector.broadcast %cst_11 : f32 to vector<1x128xf32>
    %25 = arith.mulf %23, %24 : vector<1x128xf32>
    %c0_12 = arith.constant 0 : index
    %c0_13 = arith.constant 0 : index
    %26 = vector.load %arg4[%c0_12, %c0_13] : memref<1x128xf32, #tpu.memory_space<vmem>>, vector<1x128xf32>
    %cst_14 = arith.constant 9.99999974E-6 : f32
    %27 = vector.broadcast %cst_14 : f32 to vector<1x128xf32>
    %28 = arith.addf %25, %27 : vector<1x128xf32>
    %29 = math.rsqrt %28 : vector<1x128xf32>
    %30 = arith.mulf %26, %29 : vector<1x128xf32>
    %c0_15 = arith.constant 0 : index
    %c0_16 = arith.constant 0 : index
    %31 = vector.load %arg5[%c0_15, %c0_16] : memref<1x128xf32, #tpu.memory_space<vmem>>, vector<1x128xf32>
    %32 = arith.mulf %16, %30 : vector<1x128xf32>
    %33 = arith.subf %31, %32 : vector<1x128xf32>
    %34 = vector.broadcast %30 : vector<1x128xf32> to vector<8x128xf32>
    %35 = arith.mulf %7, %34 : vector<8x128xf32>
    %36 = vector.broadcast %33 : vector<1x128xf32> to vector<8x128xf32>
    %37 = arith.addf %35, %36 : vector<8x128xf32>
    %c0_17 = arith.constant 0 : index
    %c0_18 = arith.constant 0 : index
    %38 = vector.load %arg6[%c0_17, %c0_18] : memref<128x128xf32, #tpu.memory_space<vmem>>, vector<128x128xf32>
    %cst_19 = arith.constant dense<0.000000e+00> : vector<8x128xf32>
    %39 = tpu.matmul %37, %38, %cst_19 {dimension_numbers = #tpu.dot_dimension_numbers<[1], [0], [0], [1], [0, 0, 1, 1], [], []>} : vector<8x128xf32>, vector<128x128xf32>, vector<8x128xf32> -> vector<8x128xf32>
    %c0_20 = arith.constant 0 : index
    %c0_21 = arith.constant 0 : index
    %40 = vector.load %arg7[%c0_20, %c0_21] : memref<1x128xf32, #tpu.memory_space<vmem>>, vector<1x128xf32>
    %41 = vector.broadcast %40 : vector<1x128xf32> to vector<8x128xf32>
    %42 = arith.addf %39, %41 : vector<8x128xf32>
    %43 = tpu.iota {dimensions = array<i32: 1>} : vector<8x128xi32>
    %c2_i32_22 = arith.constant 2 : i32
    %44 = vector.broadcast %c2_i32_22 : i32 to vector<8x128xi32>
    %45 = arith.cmpi slt, %43, %44 : vector<8x128xi32>
    %cst_23 = arith.constant -1.000000e+30 : f32
    %46 = vector.broadcast %cst_23 : f32 to vector<8x128xf32>
    %47 = arith.select %45, %42, %46 : vector<8x128xi1>, vector<8x128xf32>
    %cst_24 = arith.constant dense<0xFF800000> : vector<8xf32>
    %48 = vector.multi_reduction <maximumf>, %47, %cst_24 [1] : vector<8x128xf32> to vector<8xf32>
    %49 = vector.shape_cast %48 : vector<8xf32> to vector<8x1xf32>
    %50 = vector.broadcast %49 : vector<8x1xf32> to vector<8x128xf32>
    %51 = arith.subf %47, %50 : vector<8x128xf32>
    %52 = math.exp %51 : vector<8x128xf32>
    %cst_25 = arith.constant dense<0.000000e+00> : vector<8xf32>
    %53 = vector.multi_reduction <add>, %52, %cst_25 [1] : vector<8x128xf32> to vector<8xf32>
    %54 = vector.shape_cast %53 : vector<8xf32> to vector<8x1xf32>
    %55 = tpu.reciprocal %54 : vector<8x1xf32> -> vector<8x1xf32>
    %56 = vector.broadcast %55 : vector<8x1xf32> to vector<8x128xf32>
    %57 = arith.mulf %52, %56 : vector<8x128xf32>
    %c0_26 = arith.constant 0 : index
    %c0_27 = arith.constant 0 : index
    %58 = vector.load %arg8[%c0_26, %c0_27] : memref<8x128xf32, #tpu.memory_space<vmem>>, vector<8x128xf32>
    tpu.vector_store %arg8[%c0_26, %c0_27], %57 {strides = array<i32>} : memref<8x128xf32, #tpu.memory_space<vmem>>, vector<8x128xf32>,
    return
  }
  func.func @transform_0(%arg0: i32) -> (i32, i32) {
    %c0_i32 = arith.constant 0 : i32
    %c0_i32_0 = arith.constant 0 : i32
    %c0_i32_1 = arith.constant 0 : i32
    return %c0_i32, %c0_i32_0 : i32, i32
  }
  func.func @transform_1(%arg0: i32) -> (i32, i32) {
    %c0_i32 = arith.constant 0 : i32
    %c0_i32_0 = arith.constant 0 : i32
    %c0_i32_1 = arith.constant 0 : i32
    return %c0_i32, %c0_i32_0 : i32, i32
  }
  func.func @transform_2(%arg0: i32) -> (i32, i32) {
    %c0_i32 = arith.constant 0 : i32
    %c0_i32_0 = arith.constant 0 : i32
    %c0_i32_1 = arith.constant 0 : i32
    return %c0_i32, %c0_i32_0 : i32, i32
  }
  func.func @transform_3(%arg0: i32) -> (i32, i32) {
    %c0_i32 = arith.constant 0 : i32
    %c0_i32_0 = arith.constant 0 : i32
    %c0_i32_1 = arith.constant 0 : i32
    return %c0_i32, %c0_i32_0 : i32, i32
  }
  func.func @transform_4(%arg0: i32) -> (i32, i32) {
    %c0_i32 = arith.constant 0 : i32
    %c0_i32_0 = arith.constant 0 : i32
    %c0_i32_1 = arith.constant 0 : i32
    return %c0_i32, %c0_i32_0 : i32, i32
  }
  func.func @transform_5(%arg0: i32) -> (i32, i32) {
    %c0_i32 = arith.constant 0 : i32
    %c0_i32_0 = arith.constant 0 : i32
    %c0_i32_1 = arith.constant 0 : i32
    return %c0_i32, %c0_i32_0 : i32, i32
  }
  func.func @transform_6(%arg0: i32) -> (i32, i32) {
    %c0_i32 = arith.constant 0 : i32
    %c0_i32_0 = arith.constant 0 : i32
    %c0_i32_1 = arith.constant 0 : i32
    return %c0_i32, %c0_i32_0 : i32, i32
  }
  func.func @transform_7(%arg0: i32) -> (i32, i32) {
    %c0_i32 = arith.constant 0 : i32
    %c0_i32_0 = arith.constant 0 : i32
    %c0_i32_1 = arith.constant 0 : i32
    return %c0_i32, %c0_i32_0 : i32, i32
  }
}

</mosaic_0001>

<bundles_post_ra>
// kernel: tpu_custom_call.1
= control target key start
LH: loop header
LB: loop body
LE: loop exit
PB: predicated region body
PF: predicated region fallthrough
CT: control target
= control target key end

     0   :  { %12 = vsyncpa [#allocation3], 0  ;;  %s972_s0 = inlined_call_operand.hbm [shape: f32[8,516], index: 0, kind: input, shape index: {}]   ;;  %s973_s1 = inlined_call_operand.hbm [shape: f32[516,128], index: 1, kind: input, shape index: {}]   ;;  %s974_s2 = inlined_call_operand.vmem [shape: f32[1,128], index: 2, kind: input, shape index: {}]   ;;  %s975_s3 = inlined_call_operand.vmem [shape: f32[1,128], index: 3, kind: input, shape index: {}]   ;;  %s976_s4 = inlined_call_operand.vmem [shape: f32[1,128], index: 4, kind: input, shape index: {}]   ;;  %s977_s5 = inlined_call_operand.hbm [shape: f32[128,128], index: 5, kind: input, shape index: {}]   ;;  %s978_s6 = inlined_call_operand.vmem [shape: f32[1,128], index: 6, kind: input, shape index: {}]   ;;  %s979_s7 = inlined_call_operand.hbm [shape: f32[8,128], index: 7, kind: output, shape index: {}]  }
   0x1   :  { %13 = vsyncpa [#allocation6], 0 }
   0x2   :  { %14 = vsyncpa [#allocation4], 0  ;;  %s857_s24 = smov [#allocation5]   ;;  %s763_s28 = scalar_lea.hbm %s973_s1, 8320 }
   0x3   :  { %s30_s25 = sshll.u32 %s857_s24, 4  ;;  %p764_p0 = scmp.ne.s32.totalorder %s973_s1, %s763_s28  ;;  %s31_s25 = int_to_ptr.vmem [resolvable:$true] %s30_s25 }
   0x4   :  { %p767_p1 = scmp.lt.u32.totalorder %s763_s28, %s973_s1 }
   0x6   :  { %p769_p2 = pnand %p767_p1, %p764_p0 }
   0x8   :  { %772 = shalt.err (!%p769_p2)
}
   0x9   :  { %s773_s10 = scalar_lea.vmem %s31_s25, 8320  ;;  %p778_p4 = scmp.lt.s32.totalorder %s31_s25, %s31_s25 }
   0xa   :  { %p774_p3 = scmp.ne.s32.totalorder %s31_s25, %s773_s10  ;;  %p779_p5 = scmp.lt.s32.totalorder %s773_s10, %s773_s10 }
   0xc   :  { %p780_p6 = por %p779_p5, %p778_p4 }
   0xe   :  { %p781_p7 = pnand %p780_p6, %p774_p3 }
  0x10   :  { %784 = shalt.err (!%p781_p7)
}
  0x11   :  { %s858_s11 = smov 128   ;;  %s859_s12 = smov 8  }
  0x12   :  { %36 = dma.hbm_to_vmem [thread:$0]  %s973_s1, 8320, %s31_s25, [#allocation6], %s858_s11, %s858_s11, %s859_s12  }
  0x13   :  { %s860_s15 = smov [#allocation2]   ;;  %s861_s17 = smov [#allocation7]  }
  0x14   :  { %s21_s16 = sshll.u32 %s860_s15, 4  ;;  %s48_s18 = sshll.u32 %s861_s17, 4  ;;  %s22_s16 = int_to_ptr.vmem [resolvable:$true] %s21_s16  ;;  %s49_s18 = int_to_ptr.vmem [resolvable:$true] %s48_s18 }
  0x15   :  { %s785_s21 = scalar_lea.hbm %s972_s0, 640 }
  0x16   :  { %p786_p8 = scmp.ne.s32.totalorder %s972_s0, %s785_s21  ;;  %p789_p9 = scmp.lt.u32.totalorder %s785_s21, %s972_s0 }
  0x18   :  { %p791_p10 = pnand %p789_p9, %p786_p8 }
  0x1a   :  { %794 = shalt.err (!%p791_p10)
}
  0x1b   :  { %s795_s1 = scalar_lea.vmem %s22_s16, 640  ;;  %p800_p12 = scmp.lt.s32.totalorder %s22_s16, %s22_s16 }
  0x1c   :  { %p796_p11 = scmp.ne.s32.totalorder %s22_s16, %s795_s1  ;;  %p801_p13 = scmp.lt.s32.totalorder %s795_s1, %s795_s1 }
  0x1e   :  { %p802_p0 = por %p801_p13, %p800_p12 }
  0x20   :  { %p803_p1 = pnand %p802_p0, %p796_p11 }
  0x22   :  { %806 = shalt.err (!%p803_p1)
}
  0x23   :  { %24 = dma.hbm_to_vmem [thread:$0]  %s972_s0, 640, %s22_s16, [#allocation3]  }
  0x24   :  { %s807_s30 = scalar_lea.hbm %s977_s5, 2048 }
  0x25   :  { %p808_p2 = scmp.ne.s32.totalorder %s977_s5, %s807_s30  ;;  %p811_p3 = scmp.lt.u32.totalorder %s807_s30, %s977_s5 }
  0x27   :  { %p813_p4 = pnand %p811_p3, %p808_p2 }
  0x29   :  { %816 = shalt.err (!%p813_p4)
}
  0x2a   :  { %s817_s14 = scalar_lea.vmem %s49_s18, 2048  ;;  %p822_p6 = scmp.lt.s32.totalorder %s49_s18, %s49_s18 }
  0x2b   :  { %p818_p5 = scmp.ne.s32.totalorder %s49_s18, %s817_s14  ;;  %p823_p7 = scmp.lt.s32.totalorder %s817_s14, %s817_s14 }
  0x2d   :  { %p824_p8 = por %p823_p7, %p822_p6 }
  0x2f   :  { %p825_p9 = pnand %p824_p8, %p818_p5 }
  0x31   :  { %828 = shalt.err (!%p825_p9)
}
  0x32   :  { %54 = dma.hbm_to_vmem [thread:$0]  %s977_s5, 2048, %s49_s18, [#allocation6], %s858_s11, %s858_s11, %s859_s12  }
  0x33   :  { %851 = dma.done.wait [#allocation3], 640  }
  0x34   :  { %852 = vsyncadd [#allocation3], 4294966656 }
  0x35   :  { %853 = dma.done.wait [#allocation6], 10368  }
  0x36   :  { %854 = vsyncadd [#allocation6], 4294956928  ;;  %v87_v0 = vld [vmem:[#allocation5 + $0x80] sm:$0xff]  ;;  %v88_v1 = vld [vmem:[#allocation5 + $0x88] sm:$0xff]  ;;  %vm147_vm0 = vcmask 1043456   ;;  %vm143_vm1 = vcmask 31744  }
  0x37   :  { %v71_v2 = vld [vmem:[#allocation5] sm:$0xff]  ;;  %v660_v3 = vpack.c.bf16 %v88_v1, %v87_v0  ;;  %v72_v4 = vld [vmem:[#allocation5 + $0x8] sm:$0xff]  ;;  %v89_v11 = vld [vmem:[#allocation5 + $0x90] sm:$0xff]  ;;  %vm863_vm2 = vmmov 0  }
  0x38   :  { %v119_v5 = vld [vmem:[#allocation5 + $0x180] sm:$0xff]  ;;  %v120_v6 = vld [vmem:[#allocation5 + $0x188] sm:$0xff]  ;;  %v662_v7 = vpack.c.bf16 %v72_v4, %v71_v2  ;;  %v90_v13 = vld [vmem:[#allocation5 + $0x98] sm:$0xff] }
  0x39   :  { %v692_v8 = vpack.c.bf16 %v120_v6, %v119_v5  ;;  %v103_v9 = vld [vmem:[#allocation5 + $0x100] sm:$0xff]  ;;  %v104_v10 = vld [vmem:[#allocation5 + $0x108] sm:$0xff]  ;;  %661 = vmatprep.subr.bf16.mxu0 %v660_v3  ;;  %v73_v14 = vld [vmem:[#allocation5 + $0x10] sm:$0xff]  ;;  %v664_v16 = vpack.c.bf16 %v90_v13, %v89_v11 }
  0x3a   :  { %v694_v12 = vpack.c.bf16 %v104_v10, %v103_v9  ;;  %v74_v15 = vld [vmem:[#allocation5 + $0x18] sm:$0xff]  ;;  %663 = vmatpush3.bf16.msra.mxu0 %v662_v7  ;;  %v121_v18 = vld [vmem:[#allocation5 + $0x190] sm:$0xff]  ;;  %v91_v23 = vld [vmem:[#allocation5 + $0xa0] sm:$0xff] }
  0x3b   :  { %693 = vmatprep.subr.bf16.mxu1 %v692_v8  ;;  %v666_v17 = vpack.c.bf16 %v74_v15, %v73_v14  ;;  %v122_v19 = vld [vmem:[#allocation5 + $0x198] sm:$0xff]  ;;  %v105_v20 = vld [vmem:[#allocation5 + $0x110] sm:$0xff]  ;;  %v92_v24 = vld [vmem:[#allocation5 + $0xa8] sm:$0xff]  ;;  %665 = vmatprep.subr.bf16.mxu0 %v664_v16 }
  0x3c   :  { %695 = vmatpush3.bf16.msra.mxu1 %v694_v12  ;;  %v696_v21 = vpack.c.bf16 %v122_v19, %v121_v18  ;;  %v106_v22 = vld [vmem:[#allocation5 + $0x118] sm:$0xff]  ;;  %v668_v26 = vpack.c.bf16 %v92_v24, %v91_v23  ;;  %v75_v27 = vld [vmem:[#allocation5 + $0x20] sm:$0xff]  ;;  %v76_v28 = vld [vmem:[#allocation5 + $0x28] sm:$0xff] }
  0x3d   :  { %v698_v25 = vpack.c.bf16 %v106_v22, %v105_v20  ;;  %v123_v29 = vld [vmem:[#allocation5 + $0x1a0] sm:$0xff]  ;;  %v124_v30 = vld [vmem:[#allocation5 + $0x1a8] sm:$0xff]  ;;  %v670_v33 = vpack.c.bf16 %v76_v28, %v75_v27  ;;  %v93_v35 = vld [vmem:[#allocation5 + $0xb0] sm:$0xff] }
  0x3e   :  { %697 = vmatprep.subr.bf16.mxu1 %v696_v21  ;;  %v107_v31 = vld [vmem:[#allocation5 + $0x120] sm:$0xff]  ;;  %v108_v32 = vld [vmem:[#allocation5 + $0x128] sm:$0xff]  ;;  %667 = vmatpush3.bf16.msra.mxu0 %v666_v17  ;;  %v700_v34 = vpack.c.bf16 %v124_v30, %v123_v29  ;;  %v94_v36 = vld [vmem:[#allocation5 + $0xb8] sm:$0xff] }
  0x3f   :  { %v77_v37 = vld [vmem:[#allocation5 + $0x30] sm:$0xff]  ;;  %669 = vmatprep.subr.bf16.mxu0 %v668_v26  ;;  %v702_v38 = vpack.c.bf16 %v108_v32, %v107_v31  ;;  %v672_v39 = vpack.c.bf16 %v94_v36, %v93_v35  ;;  %v78_v40 = vld [vmem:[#allocation5 + $0x38] sm:$0xff]  ;;  %v95_v46 = vld [vmem:[#allocation5 + $0xc0] sm:$0xff]  ;;  %v862_v36 = vmov 0.0  }
  0x40   :  { %699 = vmatpush3.bf16.msra.mxu1 %v698_v25  ;;  %v125_v41 = vld [vmem:[#allocation5 + $0x1b0] sm:$0xff]  ;;  %v126_v42 = vld [vmem:[#allocation5 + $0x1b8] sm:$0xff]  ;;  %v96_v47 = vld [vmem:[#allocation5 + $0xc8] sm:$0xff]  ;;  %v674_v48 = vpack.c.bf16 %v78_v40, %v77_v37 }
  0x41   :  { %701 = vmatprep.subr.bf16.mxu1 %v700_v34  ;;  %v704_v43 = vpack.c.bf16 %v126_v42, %v125_v41  ;;  %v109_v44 = vld [vmem:[#allocation5 + $0x130] sm:$0xff]  ;;  %v110_v45 = vld [vmem:[#allocation5 + $0x138] sm:$0xff]  ;;  %v127_v49 = vld [vmem:[#allocation5 + $0x1c0] sm:$0xff]  ;;  %v676_v52 = vpack.c.bf16 %v96_v47, %v95_v46  ;;  %v864_v42 = vmov 0.0|0.0  }
  0x42   :  { %671 = vmatpush3.bf16.msra.mxu0 %v670_v33  ;;  %v128_v50 = vld [vmem:[#allocation5 + $0x1c8] sm:$0xff]  ;;  %v706_v51 = vpack.c.bf16 %v110_v45, %v109_v44  ;;  %v79_v53 = vld [vmem:[#allocation5 + $0x40] sm:$0xff]  ;;  %v97_v58 = vld [vmem:[#allocation5 + $0xd0] sm:$0xff] }
  0x43   :  { %673 = vmatprep.subr.bf16.mxu0 %v672_v39  ;;  %v80_v54 = vld [vmem:[#allocation5 + $0x48] sm:$0xff]  ;;  %v111_v55 = vld [vmem:[#allocation5 + $0x140] sm:$0xff]  ;;  %v708_v56 = vpack.c.bf16 %v128_v50, %v127_v49  ;;  %v98_v59 = vld [vmem:[#allocation5 + $0xd8] sm:$0xff] }
  0x44   :  { %703 = vmatpush3.bf16.msra.mxu1 %v702_v38  ;;  %v112_v57 = vld [vmem:[#allocation5 + $0x148] sm:$0xff]  ;;  %v129_v60 = vld [vmem:[#allocation5 + $0x1d0] sm:$0xff]  ;;  %v130_v61 = vld [vmem:[#allocation5 + $0x1d8] sm:$0xff]  ;;  %v678_v62 = vpack.c.bf16 %v80_v54, %v79_v53  ;;  %v680_v0 = vpack.c.bf16 %v98_v59, %v97_v58 }
  0x45   :  { %705 = vmatprep.subr.bf16.mxu1 %v704_v43  ;;  %v710_v63 = vpack.c.bf16 %v112_v57, %v111_v55  ;;  %v81_v1 = vld [vmem:[#allocation5 + $0x50] sm:$0xff]  ;;  %v82_v2 = vld [vmem:[#allocation5 + $0x58] sm:$0xff]  ;;  %v712_v4 = vpack.c.bf16 %v130_v61, %v129_v60  ;;  %v99_v6 = vld [vmem:[#allocation5 + $0xe0] sm:$0xff] }
  0x46   :  { %675 = vmatpush3.bf16.msra.mxu0 %v674_v48  ;;  %v113_v3 = vld [vmem:[#allocation5 + $0x150] sm:$0xff]  ;;  %v114_v5 = vld [vmem:[#allocation5 + $0x158] sm:$0xff]  ;;  %v100_v7 = vld [vmem:[#allocation5 + $0xe8] sm:$0xff]  ;;  %v682_v10 = vpack.c.bf16 %v82_v2, %v81_v1 }
  0x47   :  { %677 = vmatprep.subr.bf16.mxu0 %v676_v52  ;;  %v131_v8 = vld [vmem:[#allocation5 + $0x1e0] sm:$0xff]  ;;  %v132_v9 = vld [vmem:[#allocation5 + $0x1e8] sm:$0xff]  ;;  %v714_v13 = vpack.c.bf16 %v114_v5, %v113_v3  ;;  %v684_v14 = vpack.c.bf16 %v100_v7, %v99_v6  ;;  %v101_v19 = vld [vmem:[#allocation5 + $0xf0] sm:$0xff] }
  0x48   :  { %707 = vmatpush3.bf16.msra.mxu1 %v706_v51  ;;  %v83_v11 = vld [vmem:[#allocation5 + $0x60] sm:$0xff]  ;;  %v84_v12 = vld [vmem:[#allocation5 + $0x68] sm:$0xff]  ;;  %v716_v18 = vpack.c.bf16 %v132_v9, %v131_v8  ;;  %v102_v20 = vld [vmem:[#allocation5 + $0xf8] sm:$0xff] }
  0x49   :  { %709 = vmatprep.subr.bf16.mxu1 %v708_v56  ;;  %v115_v15 = vld [vmem:[#allocation5 + $0x160] sm:$0xff]  ;;  %v116_v16 = vld [vmem:[#allocation5 + $0x168] sm:$0xff]  ;;  %v69_v21 = vld [vmem:[#allocation2 + $0x18] sm:$0xff]  ;;  %v686_v24 = vpack.c.bf16 %v84_v12, %v83_v11  ;;  %v688_v26 = vpack.c.bf16 %v102_v20, %v101_v19 }
  0x4a   :  { %679 = vmatpush3.bf16.msra.mxu0 %v678_v62  ;;  %v67_v17 = vld [vmem:[#allocation2 + $0x8] sm:$0xff]  ;;  %v133_v22 = vld [vmem:[#allocation5 + $0x1f0] sm:$0xff]  ;;  %v134_v23 = vld [vmem:[#allocation5 + $0x1f8] sm:$0xff]  ;;  %285 = vmatprep.mubr.f32.mxu1 %v69_v21  ;;  %v718_v25 = vpack.c.bf16 %v116_v16, %v115_v15 }
  0x4b   :  { %681 = vmatprep.subr.bf16.mxu0 %v680_v0  ;;  %215 = vmatprep.mubr.f32.mxu0 %v67_v17  ;;  %v85_v27 = vld [vmem:[#allocation5 + $0x70] sm:$0xff]  ;;  %v86_v28 = vld [vmem:[#allocation5 + $0x78] sm:$0xff]  ;;  %v720_v29 = vpack.c.bf16 %v134_v23, %v133_v22  ;;  %v68_v35 = vld [vmem:[#allocation2 + $0x10] sm:$0xff] }
  0x4c   :  { %711 = vmatpush3.bf16.msra.mxu1 %v710_v63  ;;  %v117_v30 = vld [vmem:[#allocation5 + $0x170] sm:$0xff]  ;;  %v118_v31 = vld [vmem:[#allocation5 + $0x178] sm:$0xff]  ;;  %v690_v32 = vpack.c.bf16 %v86_v28, %v85_v27  ;;  %v135_v37 = vld [vmem:[#allocation5 + $0x200] sm:$0xf] }
  0x4d   :  { %713 = vmatprep.subr.bf16.mxu1 %v712_v4  ;;  %v722_v33 = vpack.c.bf16 %v118_v31, %v117_v30  ;;  %v66_v34 = vld [vmem:[#allocation2] sm:$0xff]  ;;  %v404_v39 = vld [vmem:[#allocation7] sm:$0xff]  ;;  %v405_v40 = vld [vmem:[#allocation7 + $0x8] sm:$0xff]  ;;  %v362_v4 = vlaneseq }
  0x4e   :  { %683 = vmatpush3.bf16.msra.mxu0 %v682_v10  ;;  %v70_v38 = vld [vmem:[#allocation2 + $0x20] sm:$0xff]  ;;  %v725_v41 = vpack.c.bf16 %v405_v40, %v404_v39  ;;  %v407_v44 = vld [vmem:[#allocation7 + $0x18] sm:$0xff]  ;;  %v408_v46 = vld [vmem:[#allocation7 + $0x20] sm:$0xff] }
  0x4f   :  { %685 = vmatprep.subr.bf16.mxu0 %v684_v14  ;;  %v406_v43 = vld [vmem:[#allocation7 + $0x10] sm:$0xff]  ;;  %v409_v47 = vld [vmem:[#allocation7 + $0x28] sm:$0xff]  ;;  %v411_v50 = vld [vmem:[#allocation7 + $0x38] sm:$0xff]  ;;  %v363_v10 = vshrl.u32 %v362_v4, 7 }
  0x50   :  { %715 = vmatpush3.bf16.msra.mxu1 %v714_v13  ;;  %v728_v45 = vpack.c.bf16 %v407_v44, %v406_v43  ;;  %v731_v48 = vpack.c.bf16 %v409_v47, %v408_v46  ;;  %v410_v49 = vld [vmem:[#allocation7 + $0x30] sm:$0xff]  ;;  %v412_v52 = vld [vmem:[#allocation7 + $0x40] sm:$0xff]  ;;  %v413_v53 = vld [vmem:[#allocation7 + $0x48] sm:$0xff] }
  0x51   :  { %717 = vmatprep.subr.bf16.mxu1 %v716_v18  ;;  %v734_v51 = vpack.c.bf16 %v411_v50, %v410_v49  ;;  %v737_v54 = vpack.c.bf16 %v413_v53, %v412_v52  ;;  %v414_v55 = vld [vmem:[#allocation7 + $0x50] sm:$0xff]  ;;  %v415_v56 = vld [vmem:[#allocation7 + $0x58] sm:$0xff]  ;;  %v416_v58 = vld [vmem:[#allocation7 + $0x60] sm:$0xff]  ;;  %vm364_vm3 = vcmp.lt.s32.totalorder %v363_v10, 2 }
  0x52   :  { %687 = vmatpush3.bf16.msra.mxu0 %v686_v24  ;;  %v740_v57 = vpack.c.bf16 %v415_v56, %v414_v55  ;;  %v417_v59 = vld [vmem:[#allocation7 + $0x68] sm:$0xff]  ;;  %v418_v61 = vld [vmem:[#allocation7 + $0x70] sm:$0xff]  ;;  %v419_v62 = vld [vmem:[#allocation7 + $0x78] sm:$0xff] }
  0x53   :  { %689 = vmatprep.subr.bf16.mxu0 %v688_v26  ;;  %v743_v60 = vpack.c.bf16 %v417_v59, %v416_v58  ;;  %v746_v63 = vpack.c.bf16 %v419_v62, %v418_v61  ;;  %v527_v1 = vld [vmem:[%s974_s2] ss:$0 sm:$0xff] }
  0x54   :  { %719 = vmatpush3.bf16.msra.mxu1 %v718_v25  ;;  %v530_v46 = vld [vmem:[%s978_s6] ss:$0 sm:$0xff] }
  0x55   :  { %721 = vmatprep.subr.bf16.mxu1 %v720_v29 }
  0x56   :  { %691 = vmatpush3.bf16.msra.mxu0 %v690_v32 }
  0x57   :  { %620 = vmatprep.subr.mxu0 %v862_v36 }
  0x58   :  { %723 = vmatpush3.bf16.msra.mxu1 %v722_v33 }
  0x59   :  { %216 = vmatmul.mubr.f32.vlgmr.msra.gmra.mrb[0].mxu0 %v66_v34  ;;  %724 = vmatprep.subr.bf16.mxu1 %v864_v42  ;;  %v383_v34 = vld [vmem:[%s975_s3] sm:$0x1]  ;;  %s865_s3 = smov [#allocation8]  }
  0x5a   :  { %621 = vmatpush3.msk.msra.mxu0 %vm147_vm0, %v135_v37  ;;  %622 = vmatprep.mubr.msk.f32.mxu0 %vm863_vm2, %v862_v36 }
  0x5b   :  { %286 = vmatmul.mubr.f32.vlgmr.msra.gmra.mrb[0].mxu1 %v68_v35  ;;  %v393_v35 = vsub.s32 0, %v363_v10 }
  0x5c   :  { %657 = vmatprep.mubr.msk.f32.mxu1 %vm863_vm2, %v862_v36  ;;  %726 = vmatpush3.bf16.msra.mxu1 %v725_v41 }
  0x5d   :  { %623 = vmatmul.mubr.msk.f32.vlgmr.msra.gmra.mrb[2].mxu0 %vm143_vm1, %v70_v38  ;;  %727 = vmatprep.subr.bf16.mxu1 %v864_v42  ;;  %v387_v38 = vld [vmem:[%s976_s4] sm:$0x1]  ;;  %s517_s4 = sshll.u32 %s865_s3, 4  ;;  %s518_s4 = int_to_ptr.vmem [resolvable:$true] %s517_s4 }
  0x5e   :  { %s829_s6 = scalar_lea.vmem %s518_s4, 128  ;;  %p834_p11 = scmp.lt.s32.totalorder %s518_s4, %s518_s4 }
  0x5f   :  { %p830_p10 = scmp.ne.s32.totalorder %s518_s4, %s829_s6  ;;  %p835_p12 = scmp.lt.s32.totalorder %s829_s6, %s829_s6 }
  0x60   :  { %729 = vmatpush3.bf16.msra.mxu1 %v728_v45  ;;  %v498_v45 = vand.u32 127, %v362_v4 }
  0x61   :  { %730 = vmatprep.subr.bf16.mxu1 %v864_v42  ;;  %p836_p13 = por %p835_p12, %p834_p11 }
  0x62   :  { %vm499_vm4 = vcmp.lt.s32.totalorder %v498_v45, 2 }
  0x63   :  { %p837_p0 = pnand %p836_p13, %p830_p10 }
  0x64   :  { %732 = vmatpush3.bf16.msra.mxu1 %v731_v48 }
  0x65   :  { %733 = vmatprep.subr.bf16.mxu1 %v864_v42 }
  0x68   :  { %735 = vmatpush3.bf16.msra.mxu1 %v734_v51 }
  0x69   :  { %736 = vmatprep.subr.bf16.mxu1 %v864_v42 }
  0x6c   :  { %738 = vmatpush3.bf16.msra.mxu1 %v737_v54 }
  0x6d   :  { %739 = vmatprep.subr.bf16.mxu1 %v864_v42 }
  0x70   :  { %741 = vmatpush3.bf16.msra.mxu1 %v740_v57 }
  0x71   :  { %742 = vmatprep.subr.bf16.mxu1 %v864_v42 }
  0x74   :  { %744 = vmatpush3.bf16.msra.mxu1 %v743_v60 }
  0x75   :  { %745 = vmatprep.subr.bf16.mxu1 %v864_v42 }
  0x78   :  { %747 = vmatpush3.bf16.msra.mxu1 %v746_v63 }
 0x12c   :  { %v563_v0 = vpop.f32.mrb[0].mxu0 }
 0x12d   :  { %v564_v2 = vpop.f32.mrb[1].mxu0 }
 0x12e   :  { %v598_v3 = vpop.f32.mrb[0].mxu1  ;;  %v565_v5 = vadd.f32 %v564_v2, %v563_v0 }
 0x12f   :  { %v599_v6 = vpop.f32.mrb[1].mxu1 }
 0x130   :  { %v600_v7 = vadd.f32 %v599_v6, %v598_v3  ;;  %v218_v8 = vadd.f32 %v565_v5, %v527_v1  ;;  %v357_v9 = vpop.f32.mrb[2].mxu0 }
 0x131   :  { %v624_v11 = vpop.f32.mrb[3].mxu0 }
 0x132   :  { %v288_v12 = vadd.f32 %v600_v7, %v218_v8 }
 0x134   :  { %v358_v13 = vadd.f32 %v357_v9, %v288_v12 }
 0x136   :  { %v361_v14 = vmax.f32 %v358_v13, 0.0 }
 0x138   :  { %v365_v15 = vsel %vm364_vm3, %v361_v14, 0.0 }
 0x139   :  { %v366_v16 = vrot.slane %v365_v15, 4 }
 0x13b   :  { %v367_v17 = vadd.f32 %v366_v16, %v365_v15 }
 0x13d   :  { %v368_v18 = vrot.slane %v367_v17, 2 }
 0x13f   :  { %v369_v19 = vadd.f32 %v368_v18, %v367_v17 }
 0x141   :  { %v370_v20 = vrot.slane %v369_v19, 1 }
 0x143   :  { %v371_v21 = vadd.f32 %v370_v20, %v369_v19 }
 0x145   :  { %v372_v22 = vmul.f32 0.5, %v371_v21 }
 0x147   :  { %v373_v23 = vsub.f32 %v361_v14, %v372_v22 }
 0x149   :  { %v374_v24 = vsel %vm364_vm3, %v373_v23, 0.0 }
 0x14a   :  { %v375_v25 = vmul.f32 %v374_v24, %v374_v24 }
 0x14c   :  { %v376_v26 = vrot.slane %v375_v25, 4 }
 0x14e   :  { %v377_v27 = vadd.f32 %v376_v26, %v375_v25 }
 0x150   :  { %v378_v28 = vrot.slane %v377_v27, 2 }
 0x152   :  { %v379_v29 = vadd.f32 %v378_v28, %v377_v27 }
 0x154   :  { %v380_v30 = vrot.slane %v379_v29, 1 }
 0x156   :  { %v381_v31 = vadd.f32 %v380_v30, %v379_v29 }
 0x158   :  { %v382_v32 = vmul.f32 0.5, %v381_v31 }
 0x15a   :  { %v384_v33 = vadd.f32 1e-05, %v382_v32 }
 0x15c   :  { %757 = vrsqrt.f32 %v384_v33 }
 0x166   :  { %v758_v36 = vpop.eup %757 }
 0x167   :  { %v386_v37 = vmul.f32 %v758_v36, %v383_v34 }
 0x169   :  { %v388_v39 = vmul.f32 %v386_v37, %v372_v22  ;;  %v394_v40 = vrot.slane %v386_v37, %v393_v35 }
 0x16b   :  { %v389_v41 = vsub.f32 %v387_v38, %v388_v39  ;;  %v396_v42 = vmul.f32 %v394_v40, %v361_v14 }
 0x16d   :  { %v401_v43 = vrot.slane %v389_v41, %v393_v35 }
 0x16f   :  { %v403_v44 = vadd.f32 %v401_v43, %v396_v42 }
 0x171   :  { %658 = vmatmul.mubr.f32.vlgmr.msra.gmra.mrb[2].mxu1 %v403_v44 }
 0x244   :  { %v493_v47 = vpop.f32.mrb[2].mxu1 }
 0x245   :  { %v494_v48 = vadd.f32 %v530_v46, %v493_v47  ;;  %v659_v49 = vpop.f32.mrb[3].mxu1 }
 0x247   :  { %v500_v50 = vsel %vm499_vm4, %v494_v48, -1e+30 }
 0x248   :  { %501 = vmax.xlane.f32.xlu0 %v500_v50 }
 0x2d5   :  { %v502_v51 = vpop.xlane.xlu0 %501 }
 0x2d6   :  { %v503_v52 = vsub.f32 %v500_v50, %v502_v51 }
 0x2d8   :  { %v504_v53 = vmul.f32 1.442695, %v503_v52 }
 0x2da   :  { %759 = vpow2.f32 %v504_v53 }
 0x2e4   :  { %v760_v54 = vpop.eup %759 }
 0x2e5   :  { %506 = vadd.xlane.f32.xlu0 %v760_v54 }
 0x372   :  { %v507_v55 = vpop.xlane.xlu0 %506 }
 0x373   :  { %761 = vrcp.f32 %v507_v55 }
 0x37d   :  { %v762_v56 = vpop.eup %761 }
 0x37e   :  { %v509_v57 = vmul.f32 %v762_v56, %v760_v54 }
 0x380   :  { %510 = vst [vmem:[#allocation8] sm:$0xff] %v509_v57 }
 0x381   :  { %840 = shalt.err (!%p837_p0)
}
 0x382   :  { %s841_s22 = scalar_lea.hbm %s979_s7, 128 }
 0x383   :  { %p842_p1 = scmp.ne.s32.totalorder %s979_s7, %s841_s22  ;;  %p845_p2 = scmp.lt.u32.totalorder %s841_s22, %s979_s7 }
 0x385   :  { %p847_p3 = pnand %p845_p2, %p842_p1 }
 0x387   :  { %850 = shalt.err (!%p847_p3)
}
 0x388   :  { %520 = dma.vmem_to_hbm [thread:$0]  %s518_s4, 128, %s979_s7, [#allocation4]  }
 0x389   :  { %855 = dma.done.wait [#allocation4], 128  }
 0x38a   :  { %856 = vsyncadd [#allocation4], 4294967168 }
 0x38b   :  { %524 = vsyncpa [#allocation3], 1 }
 0x38c   :  { %525 = vsyncpa [#allocation6], 1 }
 0x38d   :  { %526 = vsyncpa [#allocation4], 1 }

</bundles_post_ra>
